<compile_context>
chip_gen: v7x
topology: tpu7x:2x2x1
jax: 0.10.0
libtpu: 0.0.40
codegen_flags: <defaults>
</compile_context>

<pallas_src>
import functools

import jax
import jax.numpy as jnp
import numpy as np
from jax.experimental import pallas as pl
from jax.experimental.pallas import tpu as pltpu

EPS = 1e-6


def _round_up(x, m):
    return ((x + m - 1) // m) * m


def _hash_u32(v):
    # murmur3-style finalizer: full avalanche of a uint32 counter (VPU-only ops).
    v = v * jnp.uint32(0x9E3779B9)
    v = (v ^ (v >> 16)) * jnp.uint32(0x85EBCA6B)
    v = (v ^ (v >> 13)) * jnp.uint32(0xC2B2AE35)
    return v ^ (v >> 16)


def sublayer_connection_kernel(seed_ref, x_ref, w_ref, b_ref, g_ref, beta_ref,
                               o_ref, *, dropout_p, tile_m, hidden):
    # x tile: (tile_m, H).  Load x once; residual uses the same values, LN math in f32.
    x_in = x_ref[...]
    xf = x_in.astype(jnp.float32)

    # ---- LayerNorm: single-pass stats (one XLU reduction pair, var = E[x^2] - mean^2) ----
    inv_h = 1.0 / hidden
    s1 = jnp.sum(xf, axis=-1, keepdims=True)
    s2 = jnp.sum(xf * xf, axis=-1, keepdims=True)
    mean = s1 * inv_h
    var = jnp.maximum(s2 * inv_h - mean * mean, 0.0)
    xn = (xf - mean) * jax.lax.rsqrt(var + EPS)
    xn = xn * g_ref[...].astype(jnp.float32) + beta_ref[...].astype(jnp.float32)

    # ---- sublayer: Linear(H, H) on the MXU, bf16 operands / f32 accumulation ----
    h = jnp.dot(xn.astype(jnp.bfloat16), w_ref[...],
                preferred_element_type=jnp.float32)
    h = h + b_ref[...].astype(jnp.float32)

    # ---- dropout (training-mode, inverted scaling), fused counter-based PRNG ----
    if dropout_p > 0.0:
        rows = (jax.lax.broadcasted_iota(jnp.int32, h.shape, 0)
                + pl.program_id(0) * tile_m)
        cols = jax.lax.broadcasted_iota(jnp.int32, h.shape, 1)
        # Non-additive seed mixing (seed * odd 32-bit constant) so adjacent seeds do not
        # alias adjacent tiles; mask keeps the value non-negative before the uint32 cast.
        seed_mix = (seed_ref[0] * np.int32(-1640531527)) & np.int32(0x7FFFFFFF)
        ctr = ((rows * hidden + cols) ^ seed_mix) & np.int32(0x7FFFFFFF)
        bits = _hash_u32(ctr.astype(jnp.uint32))
        # Clamp so dropout_p -> 1.0 cannot overflow uint32.
        thresh = jnp.uint32(min(int(round(dropout_p * 4294967296.0)), 4294967295))
        keep = (bits >= thresh).astype(jnp.float32)
        h = h * (keep * (1.0 / (1.0 - dropout_p)))    # single multiply, no select

    # ---- residual add ----
    o_ref[...] = (xf + h).astype(o_ref.dtype)


def sublayer_connection(x, w, b, gamma, beta, seed, *, dropout_p=0.1, tile_m=512):
    """x: (B, S, H). Returns x + dropout(linear(layernorm(x)))."""
    B, S, H = x.shape
    M = B * S
    x2d = x.reshape(M, H)

    # Large row tiles; size the grid with ceil-div + padding instead of asserting M % tm.
    tm = int(min(tile_m, _round_up(M, 8)))
    m_pad = _round_up(M, tm)
    if m_pad != M:
        x2d = jnp.pad(x2d, ((0, m_pad - M), (0, 0)))

    # Keep W resident as bf16: halves its DMA/VMEM footprint and matches the MXU's native
    # bf16 operand path (accumulation stays f32 inside the kernel).
    # NOTE: W / bias / gamma / beta are grid-invariant; for large H additionally give
    # their BlockSpecs pipeline_mode=pl.Buffered(1) and set vmem_limit_bytes explicitly.
    w_bf16 = w.astype(jnp.bfloat16)

    kernel = functools.partial(sublayer_connection_kernel,
                               dropout_p=float(dropout_p), tile_m=tm, hidden=H)
    out2d = pl.pallas_call(
        kernel,
        out_shape=jax.ShapeDtypeStruct((m_pad, H), x.dtype),
        grid_spec=pltpu.PrefetchScalarGridSpec(
            num_scalar_prefetch=1,                       # seed (int32) lands in SMEM
            grid=(m_pad // tm,),
            in_specs=[
                pl.BlockSpec((tm, H), lambda i, seed: (i, 0)),   # x row tile
                pl.BlockSpec((H, H),  lambda i, seed: (0, 0)),   # W (grid-invariant)
                pl.BlockSpec((1, H),  lambda i, seed: (0, 0)),   # bias
                pl.BlockSpec((1, H),  lambda i, seed: (0, 0)),   # gamma
                pl.BlockSpec((1, H),  lambda i, seed: (0, 0)),   # beta
            ],
            out_specs=pl.BlockSpec((tm, H), lambda i, seed: (i, 0)),
        ),
        # Row tiles are independent -> parallel axis (sharded across both TCs on v7x).
        compiler_params=pltpu.CompilerParams(
            dimension_semantics=("parallel",)),
    )(seed, x2d, w_bf16, b, gamma, beta)
    if m_pad != M:
        out2d = out2d[:M]
    return out2d.reshape(B, S, H)


def _reference_no_dropout(x, w, b, gamma, beta):
    xf = x.astype(jnp.float32)
    mean = jnp.mean(xf, axis=-1, keepdims=True)
    var = jnp.mean((xf - mean) ** 2, axis=-1, keepdims=True)
    xn = (xf - mean) * jax.lax.rsqrt(var + EPS) * gamma + beta
    # Match the kernel's bf16-operand / f32-accumulate matmul.
    h = jnp.einsum("bsh,hk->bsk",
                   xn.astype(jnp.bfloat16).astype(jnp.float32),
                   w.astype(jnp.bfloat16).astype(jnp.float32)) + b
    return (xf + h).astype(x.dtype)


if __name__ == "__main__":
    B, S, H = 2, 8, 128
    key = jax.random.PRNGKey(0)
    kx, kw, kb = jax.random.split(key, 3)

    x = jax.random.normal(kx, (B, S, H), dtype=jnp.float32)
    # Deterministic "sublayer" parameters: Linear(H, H)
    w = (jax.random.normal(kw, (H, H), dtype=jnp.float32) / np.sqrt(H)).astype(jnp.float32)
    b = (jax.random.normal(kb, (1, H), dtype=jnp.float32) * 0.01).astype(jnp.float32)
    # LayerNorm parameters
    gamma = jnp.ones((1, H), dtype=jnp.float32)
    beta = jnp.zeros((1, H), dtype=jnp.float32)
    seed = jnp.array([0], dtype=jnp.int32)

    # 1) Correctness check with dropout disabled (eval-mode / p=0 identity dropout).
    out_eval = jax.block_until_ready(
        sublayer_connection(x, w, b, gamma, beta, seed, dropout_p=0.0))
    ref = _reference_no_dropout(x, w, b, gamma, beta)
    np.testing.assert_allclose(np.asarray(out_eval), np.asarray(ref),
                               rtol=1e-2, atol=1e-2)

    # 2) Training-mode run with fused in-kernel dropout (p = 0.1).
    out_train = jax.block_until_ready(
        sublayer_connection(x, w, b, gamma, beta, seed, dropout_p=0.1))
    assert out_train.shape == (B, S, H)
    assert bool(jnp.all(jnp.isfinite(out_train)))

    print("KERNEL_OK")
</pallas_src>

<mosaic_0001>
module attributes {stable_mosaic.version = 11 : i64} {
  func.func @sublayer_connection_kernel(%arg0: i32, %arg1: memref<1xi32, #tpu.memory_space<smem>>, %arg2: memref<16x128xf32, #tpu.memory_space<vmem>>, %arg3: memref<128x128xbf16, #tpu.memory_space<vmem>>, %arg4: memref<1x128xf32, #tpu.memory_space<vmem>>, %arg5: memref<1x128xf32, #tpu.memory_space<vmem>>, %arg6: memref<1x128xf32, #tpu.memory_space<vmem>>, %arg7: memref<16x128xf32, #tpu.memory_space<vmem>>) attributes {dimension_semantics = [#tpu.dimension_semantics<parallel>], iteration_bounds = array<i64: 1>, scalar_prefetch = 1 : i64, scratch_operands = 0 : i64, tpu.core_type = #tpu.core_type<tc>, window_params = [{transform_indices = @transform_0, window_bounds = array<i64: 16, 128>}, {pipeline_mode = #tpu.pipeline_mode<synchronous>, transform_indices = @transform_1, window_bounds = array<i64: 128, 128>}, {pipeline_mode = #tpu.pipeline_mode<synchronous>, transform_indices = @transform_2, window_bounds = array<i64: 1, 128>}, {pipeline_mode = #tpu.pipeline_mode<synchronous>, transform_indices = @transform_3, window_bounds = array<i64: 1, 128>}, {pipeline_mode = #tpu.pipeline_mode<synchronous>, transform_indices = @transform_4, window_bounds = array<i64: 1, 128>}, {transform_indices = @transform_5, window_bounds = array<i64: 16, 128>}]} {
    %c0 = arith.constant 0 : index
    %c0_0 = arith.constant 0 : index
    %0 = vector.load %arg2[%c0, %c0_0] : memref<16x128xf32, #tpu.memory_space<vmem>>, vector<16x128xf32>
    %cst = arith.constant dense<0.000000e+00> : vector<16xf32>
    %1 = vector.multi_reduction <add>, %0, %cst [1] : vector<16x128xf32> to vector<16xf32>
    %2 = vector.shape_cast %1 : vector<16xf32> to vector<16x1xf32>
    %3 = arith.mulf %0, %0 : vector<16x128xf32>
    %cst_1 = arith.constant dense<0.000000e+00> : vector<16xf32>
    %4 = vector.multi_reduction <add>, %3, %cst_1 [1] : vector<16x128xf32> to vector<16xf32>
    %5 = vector.shape_cast %4 : vector<16xf32> to vector<16x1xf32>
    %cst_2 = arith.constant 7.812500e-03 : f32
    %6 = vector.broadcast %cst_2 : f32 to vector<16x1xf32>
    %7 = arith.mulf %2, %6 : vector<16x1xf32>
    %cst_3 = arith.constant 7.812500e-03 : f32
    %8 = vector.broadcast %cst_3 : f32 to vector<16x1xf32>
    %9 = arith.mulf %5, %8 : vector<16x1xf32>
    %10 = arith.mulf %7, %7 : vector<16x1xf32>
    %11 = arith.subf %9, %10 : vector<16x1xf32>
    %cst_4 = arith.constant 0.000000e+00 : f32
    %12 = vector.broadcast %cst_4 : f32 to vector<16x1xf32>
    %13 = arith.maximumf %11, %12 : vector<16x1xf32>
    %14 = vector.broadcast %7 : vector<16x1xf32> to vector<16x128xf32>
    %15 = arith.subf %0, %14 : vector<16x128xf32>
    %cst_5 = arith.constant 9.99999997E-7 : f32
    %16 = vector.broadcast %cst_5 : f32 to vector<16x1xf32>
    %17 = arith.addf %13, %16 : vector<16x1xf32>
    %18 = math.rsqrt %17 : vector<16x1xf32>
    %19 = vector.broadcast %18 : vector<16x1xf32> to vector<16x128xf32>
    %20 = arith.mulf %15, %19 : vector<16x128xf32>
    %c0_6 = arith.constant 0 : index
    %c0_7 = arith.constant 0 : index
    %21 = vector.load %arg5[%c0_6, %c0_7] : memref<1x128xf32, #tpu.memory_space<vmem>>, vector<1x128xf32>
    %22 = vector.broadcast %21 : vector<1x128xf32> to vector<16x128xf32>
    %23 = arith.mulf %20, %22 : vector<16x128xf32>
    %c0_8 = arith.constant 0 : index
    %c0_9 = arith.constant 0 : index
    %24 = vector.load %arg6[%c0_8, %c0_9] : memref<1x128xf32, #tpu.memory_space<vmem>>, vector<1x128xf32>
    %25 = vector.broadcast %24 : vector<1x128xf32> to vector<16x128xf32>
    %26 = arith.addf %23, %25 : vector<16x128xf32>
    %27 = arith.truncf %26 : vector<16x128xf32> to vector<16x128xbf16>
    %c0_10 = arith.constant 0 : index
    %c0_11 = arith.constant 0 : index
    %28 = vector.load %arg3[%c0_10, %c0_11] : memref<128x128xbf16, #tpu.memory_space<vmem>>, vector<128x128xbf16>
    %cst_12 = arith.constant dense<0.000000e+00> : vector<16x128xf32>
    %29 = tpu.matmul %27, %28, %cst_12 {dimension_numbers = #tpu.dot_dimension_numbers<[1], [0], [0], [1], [0, 0, 1, 1], [], []>} : vector<16x128xbf16>, vector<128x128xbf16>, vector<16x128xf32> -> vector<16x128xf32>
    %c0_13 = arith.constant 0 : index
    %c0_14 = arith.constant 0 : index
    %30 = vector.load %arg4[%c0_13, %c0_14] : memref<1x128xf32, #tpu.memory_space<vmem>>, vector<1x128xf32>
    %31 = vector.broadcast %30 : vector<1x128xf32> to vector<16x128xf32>
    %32 = arith.addf %29, %31 : vector<16x128xf32>
    %33 = arith.addf %0, %32 : vector<16x128xf32>
    %c0_15 = arith.constant 0 : index
    %c0_16 = arith.constant 0 : index
    %34 = vector.load %arg7[%c0_15, %c0_16] : memref<16x128xf32, #tpu.memory_space<vmem>>, vector<16x128xf32>
    tpu.vector_store %arg7[%c0_15, %c0_16], %33 {strides = array<i32>} : memref<16x128xf32, #tpu.memory_space<vmem>>, vector<16x128xf32>,
    return
  }
  func.func @transform_0(%arg0: i32, %arg1: memref<1xi32, #tpu.memory_space<smem>>) -> (i32, i32) {
    %c0_i32 = arith.constant 0 : i32
    %c0_i32_0 = arith.constant 0 : i32
    return %arg0, %c0_i32 : i32, i32
  }
  func.func @transform_1(%arg0: i32, %arg1: memref<1xi32, #tpu.memory_space<smem>>) -> (i32, i32) {
    %c0_i32 = arith.constant 0 : i32
    %c0_i32_0 = arith.constant 0 : i32
    %c0_i32_1 = arith.constant 0 : i32
    return %c0_i32, %c0_i32_0 : i32, i32
  }
  func.func @transform_2(%arg0: i32, %arg1: memref<1xi32, #tpu.memory_space<smem>>) -> (i32, i32) {
    %c0_i32 = arith.constant 0 : i32
    %c0_i32_0 = arith.constant 0 : i32
    %c0_i32_1 = arith.constant 0 : i32
    return %c0_i32, %c0_i32_0 : i32, i32
  }
  func.func @transform_3(%arg0: i32, %arg1: memref<1xi32, #tpu.memory_space<smem>>) -> (i32, i32) {
    %c0_i32 = arith.constant 0 : i32
    %c0_i32_0 = arith.constant 0 : i32
    %c0_i32_1 = arith.constant 0 : i32
    return %c0_i32, %c0_i32_0 : i32, i32
  }
  func.func @transform_4(%arg0: i32, %arg1: memref<1xi32, #tpu.memory_space<smem>>) -> (i32, i32) {
    %c0_i32 = arith.constant 0 : i32
    %c0_i32_0 = arith.constant 0 : i32
    %c0_i32_1 = arith.constant 0 : i32
    return %c0_i32, %c0_i32_0 : i32, i32
  }
  func.func @transform_5(%arg0: i32, %arg1: memref<1xi32, #tpu.memory_space<smem>>) -> (i32, i32) {
    %c0_i32 = arith.constant 0 : i32
    %c0_i32_0 = arith.constant 0 : i32
    return %arg0, %c0_i32 : i32, i32
  }
}

</mosaic_0001>

<bundles_post_ra>
// kernel: tpu_custom_call.1
= control target key start
LH: loop header
LB: loop body
LE: loop exit
PB: predicated region body
PF: predicated region fallthrough
CT: control target
= control target key end

     0   :  { %12 = vsyncpa [#allocation5], 0  ;;  %s477_s0 = inlined_call_operand.<no memory space> [shape: s32[1], index: 0, kind: input, shape index: {}]   ;;  %s478_s1 = inlined_call_operand.hbm [shape: f32[16,128], index: 1, kind: input, shape index: {}]   ;;  %s479_s2 = inlined_call_operand.hbm [shape: bf16[128,128], index: 2, kind: input, shape index: {}]   ;;  %s480_s3 = inlined_call_operand.vmem [shape: f32[1,128], index: 3, kind: input, shape index: {}]   ;;  %s481_s4 = inlined_call_operand.vmem [shape: f32[1,128], index: 4, kind: input, shape index: {}]   ;;  %s482_s5 = inlined_call_operand.vmem [shape: f32[1,128], index: 5, kind: input, shape index: {}]   ;;  %s483_s6 = inlined_call_operand.hbm [shape: f32[16,128], index: 6, kind: output, shape index: {}]  }
   0x1   :  { %13 = vsyncpa [#allocation8], 0 }
   0x2   :  { %14 = vsyncpa [#allocation6], 0  ;;  %s368_s0 = smov [#allocation4]   ;;  %s296_s24 = scalar_lea.hbm %s478_s1, 256 }
   0x3   :  { %s20_s21 = sshll.u32 %s368_s0, 4  ;;  %p297_p0 = scmp.ne.s32.totalorder %s478_s1, %s296_s24  ;;  %s21_s21 = int_to_ptr.vmem [resolvable:$true] %s20_s21 }
   0x4   :  { %p300_p1 = scmp.lt.u32.totalorder %s296_s24, %s478_s1 }
   0x6   :  { %p302_p2 = pnand %p300_p1, %p297_p0 }
   0x8   :  { %305 = shalt.err (!%p302_p2)
}
   0x9   :  { %s306_s29 = scalar_lea.vmem %s21_s21, 256  ;;  %p311_p4 = scmp.lt.s32.totalorder %s21_s21, %s21_s21 }
   0xa   :  { %p307_p3 = scmp.ne.s32.totalorder %s21_s21, %s306_s29  ;;  %p312_p5 = scmp.lt.s32.totalorder %s306_s29, %s306_s29 }
   0xc   :  { %p313_p6 = por %p312_p5, %p311_p4 }
   0xe   :  { %p314_p7 = pnand %p313_p6, %p307_p3 }
  0x10   :  { %317 = shalt.err (!%p314_p7)
}
  0x11   :  { %s369_s30 = smov 128   ;;  %s370_s7 = smov 8  }
  0x12   :  { %26 = dma.hbm_to_vmem [thread:$0]  %s478_s1, 256, %s21_s21, [#allocation5], %s369_s30, %s369_s30, %s370_s7  }
  0x13   :  { %s371_s10 = smov [#allocation7]   ;;  %s318_s14 = scalar_lea.hbm %s479_s2, 1024 }
  0x14   :  { %s32_s11 = sshll.u32 %s371_s10, 4  ;;  %p319_p8 = scmp.ne.s32.totalorder %s479_s2, %s318_s14  ;;  %s33_s11 = int_to_ptr.vmem [resolvable:$true] %s32_s11 }
  0x15   :  { %p322_p9 = scmp.lt.u32.totalorder %s318_s14, %s479_s2 }
  0x17   :  { %p324_p10 = pnand %p322_p9, %p319_p8 }
  0x19   :  { %327 = shalt.err (!%p324_p10)
}
  0x1a   :  { %s328_s19 = scalar_lea.vmem %s33_s11, 1024  ;;  %p333_p12 = scmp.lt.s32.totalorder %s33_s11, %s33_s11 }
  0x1b   :  { %p329_p11 = scmp.ne.s32.totalorder %s33_s11, %s328_s19  ;;  %p334_p13 = scmp.lt.s32.totalorder %s328_s19, %s328_s19 }
  0x1d   :  { %p335_p0 = por %p334_p13, %p333_p12 }
  0x1f   :  { %p336_p1 = pnand %p335_p0, %p329_p11 }
  0x21   :  { %339 = shalt.err (!%p336_p1)
}
  0x22   :  { %s372_s1 = smov 64   ;;  %s373_s20 = smov 4  }
  0x23   :  { %38 = dma.hbm_to_vmem [thread:$0]  %s479_s2, 1024, %s33_s11, [#allocation8], %s372_s1, %s372_s1, %s373_s20  }
  0x24   :  { %362 = dma.done.wait [#allocation5], 256  }
  0x25   :  { %363 = vsyncadd [#allocation5], 4294967040 }
  0x26   :  { %364 = dma.done.wait [#allocation8], 1024  }
  0x27   :  { %365 = vsyncadd [#allocation8], 4294966272  ;;  %v439_v0 = vld [vmem:[#allocation4] sm:$0xff]  ;;  %v441_v1 = vld [vmem:[#allocation4 + $0x8] sm:$0xff]  ;;  %v374_v5 = vmov 0.0   ;;  %vm375_vm0 = vmmov 0  }
  0x28   :  { %54 = vadd.xlane.f32.xlu0 %v439_v0  ;;  %v58_v2 = vmul.f32 %v439_v0, %v439_v0  ;;  %v59_v3 = vmul.f32 %v441_v1, %v441_v1  ;;  %v284_v4 = vld [vmem:[#allocation7] sm:$0xff]   ;;  %255 = vmatprep.subr.bf16.mxu0 %v374_v5  ;;  %v285_v6 = vld [vmem:[#allocation7 + $0x8] sm:$0xff]   ;;  %v286_v7 = vld [vmem:[#allocation7 + $0x10] sm:$0xff]  }
  0x29   :  { %256 = vmatpush3.bf16.msra.mxu0 %v284_v4  ;;  %v287_v8 = vld [vmem:[#allocation7 + $0x18] sm:$0xff]   ;;  %v288_v9 = vld [vmem:[#allocation7 + $0x20] sm:$0xff]   ;;  %271 = vmatprep.mubr.msk.bf16.mxu0 %vm375_vm0, %v374_v5  ;;  %v289_v10 = vld [vmem:[#allocation7 + $0x28] sm:$0xff]  }
  0x2a   :  { %60 = vadd.xlane.f32.xlu1 %v58_v2  ;;  %257 = vmatprep.subr.bf16.mxu0 %v374_v5  ;;  %v290_v11 = vld [vmem:[#allocation7 + $0x30] sm:$0xff]   ;;  %v291_v12 = vld [vmem:[#allocation7 + $0x38] sm:$0xff]  }
  0x2b   :  { %v235_v32 = vld [vmem:[%s481_s4] ss:$0 sm:$0xff]  ;;  %s376_s4 = smov [#allocation9]  }
  0x2c   :  { %56 = vadd.xlane.f32.xlu0 %v441_v1  ;;  %v236_v37 = vld [vmem:[%s482_s5] ss:$0 sm:$0xff]  ;;  %s222_s27 = sshll.u32 %s376_s4, 4  ;;  %s223_s27 = int_to_ptr.vmem [resolvable:$true] %s222_s27 }
  0x2d   :  { %258 = vmatpush3.bf16.msra.mxu0 %v285_v6  ;;  %v237_v42 = vld [vmem:[%s480_s3] ss:$0 sm:$0xff]  ;;  %s340_s5 = scalar_lea.vmem %s223_s27, 256  ;;  %p345_p3 = scmp.lt.s32.totalorder %s223_s27, %s223_s27 }
  0x2e   :  { %62 = vadd.xlane.f32.xlu1 %v59_v3  ;;  %259 = vmatprep.subr.bf16.mxu0 %v374_v5  ;;  %p341_p2 = scmp.ne.s32.totalorder %s223_s27, %s340_s5  ;;  %p346_p4 = scmp.lt.s32.totalorder %s340_s5, %s340_s5 }
  0x30   :  { %p347_p5 = por %p346_p4, %p345_p3 }
  0x31   :  { %260 = vmatpush3.bf16.msra.mxu0 %v286_v7 }
  0x32   :  { %261 = vmatprep.subr.bf16.mxu0 %v374_v5  ;;  %p348_p6 = pnand %p347_p5, %p341_p2 }
  0x35   :  { %262 = vmatpush3.bf16.msra.mxu0 %v287_v8 }
  0x36   :  { %263 = vmatprep.subr.bf16.mxu0 %v374_v5 }
  0x39   :  { %264 = vmatpush3.bf16.msra.mxu0 %v288_v9 }
  0x3a   :  { %265 = vmatprep.subr.bf16.mxu0 %v374_v5 }
  0x3d   :  { %266 = vmatpush3.bf16.msra.mxu0 %v289_v10 }
  0x3e   :  { %267 = vmatprep.subr.bf16.mxu0 %v374_v5 }
  0x41   :  { %268 = vmatpush3.bf16.msra.mxu0 %v290_v11 }
  0x42   :  { %269 = vmatprep.subr.bf16.mxu0 %v374_v5 }
  0x45   :  { %270 = vmatpush3.bf16.msra.mxu0 %v291_v12 }
  0xb5   :  { %v55_v13 = vpop.xlane.xlu0 %54 }
  0xb6   :  { %v64_v14 = vmul.f32 0.0078125, %v55_v13 }
  0xb7   :  { %v61_v15 = vpop.xlane.xlu1 %60 }
  0xb8   :  { %v68_v16 = vmul.f32 %v64_v14, %v64_v14  ;;  %v66_v17 = vmul.f32 0.0078125, %v61_v15  ;;  %v74_v29 = vsub.f32 %v439_v0, %v64_v14 }
  0xb9   :  { %v57_v18 = vpop.xlane.xlu0 %56 }
  0xba   :  { %v70_v19 = vsub.f32 %v66_v17, %v68_v16  ;;  %v65_v20 = vmul.f32 0.0078125, %v57_v18 }
  0xbb   :  { %v63_v21 = vpop.xlane.xlu1 %62 }
  0xbc   :  { %v72_v22 = vmax.f32 %v70_v19, 0.0  ;;  %v69_v23 = vmul.f32 %v65_v20, %v65_v20  ;;  %v67_v24 = vmul.f32 0.0078125, %v63_v21  ;;  %v75_v33 = vsub.f32 %v441_v1, %v65_v20 }
  0xbe   :  { %v76_v25 = vadd.f32 1e-06, %v72_v22  ;;  %v71_v26 = vsub.f32 %v67_v24, %v69_v23 }
  0xc0   :  { %292 = vrsqrt.f32 %v76_v25  ;;  %v73_v27 = vmax.f32 %v71_v26, 0.0 }
  0xc2   :  { %v77_v28 = vadd.f32 1e-06, %v73_v27 }
  0xc4   :  { %294 = vrsqrt.f32 %v77_v28 }
  0xca   :  { %v293_v30 = vpop.eup %292 }
  0xcb   :  { %v80_v31 = vmul.f32 %v293_v30, %v74_v29 }
  0xcd   :  { %v89_v36 = vmul.f32 %v235_v32, %v80_v31 }
  0xce   :  { %v295_v34 = vpop.eup %294 }
  0xcf   :  { %v81_v35 = vmul.f32 %v295_v34, %v75_v33  ;;  %v98_v39 = vadd.f32 %v236_v37, %v89_v36 }
  0xd1   :  { %v90_v38 = vmul.f32 %v235_v32, %v81_v35 }
  0xd3   :  { %v99_v40 = vadd.f32 %v236_v37, %v90_v38 }
  0xd5   :  { %v100_v41 = vpack.c.bf16 %v99_v40, %v98_v39 }
  0xd7   :  { %272 = vmatmul.mubr.bf16.vlgmr.msra.gmra.mrb[0].mxu0 %v100_v41 }
 0x1aa   :  { %v206_v43 = vpop.f32.mrb[0].mxu0 }
 0x1ab   :  { %v207_v44 = vadd.f32 %v237_v42, %v206_v43  ;;  %v273_v45 = vpop.f32.mrb[1].mxu0 }
 0x1ac   :  { %v209_v46 = vpop.f32.mrb[2].mxu0 }
 0x1ad   :  { %v213_v47 = vadd.f32 %v207_v44, %v439_v0  ;;  %v210_v48 = vadd.f32 %v237_v42, %v209_v46  ;;  %v274_v49 = vpop.f32.mrb[3].mxu0 }
 0x1af   :  { %215 = vst [vmem:[#allocation9] sm:$0xff] %v213_v47  ;;  %v214_v50 = vadd.f32 %v210_v48, %v441_v1 }
 0x1b1   :  { %216 = vst [vmem:[#allocation9 + $0x8] sm:$0xff] %v214_v50 }
 0x1b2   :  { %351 = shalt.err (!%p348_p6)
}
 0x1b3   :  { %s352_s29 = scalar_lea.hbm %s483_s6, 256 }
 0x1b4   :  { %p353_p7 = scmp.ne.s32.totalorder %s483_s6, %s352_s29  ;;  %p356_p8 = scmp.lt.u32.totalorder %s352_s29, %s483_s6 }
 0x1b6   :  { %p358_p9 = pnand %p356_p8, %p353_p7 }
 0x1b8   :  { %361 = shalt.err (!%p358_p9)
}
 0x1b9   :  { %228 = dma.vmem_to_hbm [thread:$0]  %s223_s27, 256, %s483_s6, [#allocation6], %s369_s30, %s369_s30, %s370_s7  }
 0x1ba   :  { %366 = dma.done.wait [#allocation6], 256  }
 0x1bb   :  { %367 = vsyncadd [#allocation6], 4294967040 }
 0x1bc   :  { %232 = vsyncpa [#allocation5], 1 }
 0x1bd   :  { %233 = vsyncpa [#allocation8], 1 }
 0x1be   :  { %234 = vsyncpa [#allocation6], 1 }

</bundles_post_ra>
